<compile_context>
chip_gen: v7x
topology: tpu7x:2x2x1
jax: 0.10.0
libtpu: 0.0.40
codegen_flags: <defaults>
</compile_context>

<pallas_src>
import math

import jax
import jax.numpy as jnp
from jax.experimental import pallas as pl
from jax.experimental.pallas import tpu as pltpu


def _level_params(H, W, levels):
    """MaxPool2d kernel/stride/output sizes for every SPP level."""
    params = []
    for l in range(levels):
        kh = int(math.ceil(H / (l + 1)))
        kw = int(math.ceil(W / (l + 1)))
        sh = int(math.floor(H / (l + 1)))
        sw = int(math.floor(W / (l + 1)))
        if sh == 0 or sw == 0:
            raise ValueError(
                f"SPP level {l}: stride would be 0 for input {H}x{W} "
                f"(need H >= {l + 1} and W >= {l + 1}).")
        oh = (H - kh) // sh + 1
        ow = (W - kw) // sw + 1
        params.append((kh, kw, sh, sw, oh, ow))
    return params


def _pick_channel_tile(C, H, W, itemsize, budget_bytes=8 << 20):
    """Largest channel tile TC with an (H, W, TC) block under budget and a
    legal last-dim layout (TC % 128 == 0, or TC == C i.e. full extent)."""
    if C % 128 != 0:
        return C                       # full extent is always a legal last dim
    tc = C
    while tc > 128:
        if C % tc == 0 and H * W * tc * itemsize <= budget_bytes:
            return tc
        tc -= 128
    return 128


def _make_spp_kernel(level_params):
    """Fused kernel: computes every pyramid level from one (1, H, W, TC) slab.

    Layout inside the block: W -> sublanes, TC -> lanes, H -> separate vreg
    groups.  Max over H is therefore a pure-VPU elementwise max; the final
    max over the kw window columns is a small XLU sublane reduce.
    """

    def kernel(x_ref, *out_refs):
        for (kh, kw, sh, sw, oh, ow), o_ref in zip(level_params, out_refs):
            for i in range(oh):
                # One VPU reduction over the kh window rows, shared by every
                # bin in this row of the level's output grid.
                hslab = jnp.max(x_ref[:, i * sh:i * sh + kh, :, :],
                                axis=1)                         # (1, W, TC)
                for j in range(ow):
                    m = jnp.max(hslab[:, j * sw:j * sw + kw, :],
                                axis=1, keepdims=True)          # (1, 1, TC)
                    # Direct store into the bin's row — no stack/concat
                    # relayouts; TC stays lane-dense.
                    o_ref[:, i * ow + j:i * ow + j + 1, :] = m

    return kernel


def spatial_pyramid_pooling(x, levels):
    """JAX/Pallas equivalent of the PyTorch SpatialPyramidPooling.forward."""
    N, C, H, W = x.shape
    params = _level_params(H, W, levels)
    itemsize = jnp.dtype(x.dtype).itemsize

    tc = _pick_channel_tile(C, H, W, itemsize)
    grid = (N, C // tc)

    # Layout plumbing: channel-last so C maps to the 128-lane axis in-kernel.
    x_nhwc = jnp.transpose(x, (0, 2, 3, 1))                     # (N, H, W, C)

    out_shapes = tuple(
        jax.ShapeDtypeStruct((N, oh * ow, C), x.dtype)
        for (_, _, _, _, oh, ow) in params)
    out_specs = tuple(
        pl.BlockSpec((1, oh * ow, tc), lambda n, c: (n, 0, c))
        for (_, _, _, _, oh, ow) in params)
    in_specs = [pl.BlockSpec((1, H, W, tc), lambda n, c: (n, 0, 0, c))]

    in_block = H * W * tc * itemsize
    out_block = sum(oh * ow for (_, _, _, _, oh, ow) in params) * tc * itemsize
    # Double-buffered in/out blocks + headroom; cap at 48 MiB so it also fits
    # v7x's 64 MiB physical VMEM, floor at the 32 MiB scoped default.
    vmem_limit = int(max(32 << 20,
                         min(4 * (in_block + out_block) + (1 << 20), 48 << 20)))

    pooled = pl.pallas_call(
        _make_spp_kernel(params),
        out_shape=out_shapes,
        grid=grid,
        in_specs=in_specs,
        out_specs=out_specs,
        compiler_params=pltpu.CompilerParams(
            dimension_semantics=("parallel", "parallel"),
            vmem_limit_bytes=vmem_limit),
    )(x_nhwc)

    # Channel-major flatten per level (matches `bin.view(N, -1)` on NCHW bins),
    # then concat across levels — tiny tensors, cheap wrapper-side plumbing.
    flat = [jnp.transpose(p, (0, 2, 1)).reshape(N, -1) for p in pooled]
    return jnp.concatenate(flat, axis=1)


def _reference_spp(x, levels):
    """Pure-JAX reference for correctness checking (PyTorch semantics, NCHW)."""
    N, C, H, W = x.shape
    outs = []
    for (kh, kw, sh, sw, oh, ow) in _level_params(H, W, levels):
        pooled = jnp.stack(
            [jnp.stack(
                [jnp.max(x[:, :, i * sh:i * sh + kh, j * sw:j * sw + kw],
                         axis=(2, 3)) for j in range(ow)], axis=-1)
             for i in range(oh)], axis=-2)
        outs.append(pooled.reshape(N, -1))
    return jnp.concatenate(outs, axis=1)


if __name__ == "__main__":
    # No learnable parameters in this module; `levels` is a hyperparameter.
    LEVELS = 3
    key = jax.random.PRNGKey(0)
    x = jax.random.normal(key, (2, 4, 16, 16), dtype=jnp.float32)

    out = spatial_pyramid_pooling(x, LEVELS)
    out = jax.block_until_ready(out)

    ref = _reference_spp(x, LEVELS)
    assert out.shape == (2, 4 * (1 * 1 + 2 * 2 + 3 * 3)), out.shape
    assert jnp.allclose(out, ref), "Pallas SPP mismatch vs JAX reference"

    print("KERNEL_OK")
</pallas_src>

<mosaic_0001>
module attributes {stable_mosaic.version = 11 : i64} {
  func.func @kernel(%arg0: i32, %arg1: i32, %arg2: memref<1x16x16x4xf32, #tpu.memory_space<vmem>>, %arg3: memref<1x1x4xf32, #tpu.memory_space<vmem>>, %arg4: memref<1x4x4xf32, #tpu.memory_space<vmem>>, %arg5: memref<1x9x4xf32, #tpu.memory_space<vmem>>) attributes {dimension_semantics = [#tpu.dimension_semantics<parallel>, #tpu.dimension_semantics<parallel>], iteration_bounds = array<i64: 2, 1>, scalar_prefetch = 0 : i64, scratch_operands = 0 : i64, tpu.core_type = #tpu.core_type<tc>, window_params = [{transform_indices = @transform_0, window_bounds = array<i64: 1, 16, 16, 4>}, {transform_indices = @transform_1, window_bounds = array<i64: 1, 1, 4>}, {transform_indices = @transform_2, window_bounds = array<i64: 1, 4, 4>}, {transform_indices = @transform_3, window_bounds = array<i64: 1, 9, 4>}]} {
    %c0 = arith.constant 0 : index
    %c0_0 = arith.constant 0 : index
    %c0_1 = arith.constant 0 : index
    %c0_2 = arith.constant 0 : index
    %0 = vector.load %arg2[%c0, %c0_0, %c0_1, %c0_2] : memref<1x16x16x4xf32, #tpu.memory_space<vmem>>, vector<1x16x16x4xf32>
    %cst = arith.constant dense<0xFF800000> : vector<1x16x4xf32>
    %1 = vector.multi_reduction <maximumf>, %0, %cst [1] : vector<1x16x16x4xf32> to vector<1x16x4xf32>
    %cst_3 = arith.constant dense<0xFF800000> : vector<1x4xf32>
    %2 = vector.multi_reduction <maximumf>, %1, %cst_3 [1] : vector<1x16x4xf32> to vector<1x4xf32>
    %3 = vector.shape_cast %2 : vector<1x4xf32> to vector<1x1x4xf32>
    %c0_4 = arith.constant 0 : index
    %c0_5 = arith.constant 0 : index
    %c0_6 = arith.constant 0 : index
    %4 = vector.load %arg3[%c0_4, %c0_5, %c0_6] : memref<1x1x4xf32, #tpu.memory_space<vmem>>, vector<1x1x4xf32>
    tpu.vector_store %arg3[%c0_4, %c0_5, %c0_6], %3 {strides = array<i32>} : memref<1x1x4xf32, #tpu.memory_space<vmem>>, vector<1x1x4xf32>,
    %c0_7 = arith.constant 0 : index
    %c0_8 = arith.constant 0 : index
    %c0_9 = arith.constant 0 : index
    %c0_10 = arith.constant 0 : index
    %5 = vector.load %arg2[%c0_7, %c0_8, %c0_9, %c0_10] : memref<1x16x16x4xf32, #tpu.memory_space<vmem>>, vector<1x8x16x4xf32>
    %cst_11 = arith.constant dense<0xFF800000> : vector<1x16x4xf32>
    %6 = vector.multi_reduction <maximumf>, %5, %cst_11 [1] : vector<1x8x16x4xf32> to vector<1x16x4xf32>
    %7 = vector.extract_strided_slice %6 {offsets = [0, 0, 0], sizes = [1, 8, 4], strides = [1, 1, 1]} : vector<1x16x4xf32> to vector<1x8x4xf32>
    %cst_12 = arith.constant dense<0xFF800000> : vector<1x4xf32>
    %8 = vector.multi_reduction <maximumf>, %7, %cst_12 [1] : vector<1x8x4xf32> to vector<1x4xf32>
    %9 = vector.shape_cast %8 : vector<1x4xf32> to vector<1x1x4xf32>
    %c0_13 = arith.constant 0 : index
    %c0_14 = arith.constant 0 : index
    %c0_15 = arith.constant 0 : index
    %10 = vector.load %arg4[%c0_13, %c0_14, %c0_15] : memref<1x4x4xf32, #tpu.memory_space<vmem>>, vector<1x1x4xf32>
    tpu.vector_store %arg4[%c0_13, %c0_14, %c0_15], %9 {strides = array<i32>} : memref<1x4x4xf32, #tpu.memory_space<vmem>>, vector<1x1x4xf32>,
    %11 = vector.extract_strided_slice %6 {offsets = [0, 8, 0], sizes = [1, 8, 4], strides = [1, 1, 1]} : vector<1x16x4xf32> to vector<1x8x4xf32>
    %cst_16 = arith.constant dense<0xFF800000> : vector<1x4xf32>
    %12 = vector.multi_reduction <maximumf>, %11, %cst_16 [1] : vector<1x8x4xf32> to vector<1x4xf32>
    %13 = vector.shape_cast %12 : vector<1x4xf32> to vector<1x1x4xf32>
    %c0_17 = arith.constant 0 : index
    %c1 = arith.constant 1 : index
    %c0_18 = arith.constant 0 : index
    %14 = vector.load %arg4[%c0_17, %c1, %c0_18] : memref<1x4x4xf32, #tpu.memory_space<vmem>>, vector<1x1x4xf32>
    tpu.vector_store %arg4[%c0_17, %c1, %c0_18], %13 {strides = array<i32>} : memref<1x4x4xf32, #tpu.memory_space<vmem>>, vector<1x1x4xf32>,
    %c0_19 = arith.constant 0 : index
    %c8 = arith.constant 8 : index
    %c0_20 = arith.constant 0 : index
    %c0_21 = arith.constant 0 : index
    %15 = vector.load %arg2[%c0_19, %c8, %c0_20, %c0_21] : memref<1x16x16x4xf32, #tpu.memory_space<vmem>>, vector<1x8x16x4xf32>
    %cst_22 = arith.constant dense<0xFF800000> : vector<1x16x4xf32>
    %16 = vector.multi_reduction <maximumf>, %15, %cst_22 [1] : vector<1x8x16x4xf32> to vector<1x16x4xf32>
    %17 = vector.extract_strided_slice %16 {offsets = [0, 0, 0], sizes = [1, 8, 4], strides = [1, 1, 1]} : vector<1x16x4xf32> to vector<1x8x4xf32>
    %cst_23 = arith.constant dense<0xFF800000> : vector<1x4xf32>
    %18 = vector.multi_reduction <maximumf>, %17, %cst_23 [1] : vector<1x8x4xf32> to vector<1x4xf32>
    %19 = vector.shape_cast %18 : vector<1x4xf32> to vector<1x1x4xf32>
    %c0_24 = arith.constant 0 : index
    %c2 = arith.constant 2 : index
    %c0_25 = arith.constant 0 : index
    %20 = vector.load %arg4[%c0_24, %c2, %c0_25] : memref<1x4x4xf32, #tpu.memory_space<vmem>>, vector<1x1x4xf32>
    tpu.vector_store %arg4[%c0_24, %c2, %c0_25], %19 {strides = array<i32>} : memref<1x4x4xf32, #tpu.memory_space<vmem>>, vector<1x1x4xf32>,
    %21 = vector.extract_strided_slice %16 {offsets = [0, 8, 0], sizes = [1, 8, 4], strides = [1, 1, 1]} : vector<1x16x4xf32> to vector<1x8x4xf32>
    %cst_26 = arith.constant dense<0xFF800000> : vector<1x4xf32>
    %22 = vector.multi_reduction <maximumf>, %21, %cst_26 [1] : vector<1x8x4xf32> to vector<1x4xf32>
    %23 = vector.shape_cast %22 : vector<1x4xf32> to vector<1x1x4xf32>
    %c0_27 = arith.constant 0 : index
    %c3 = arith.constant 3 : index
    %c0_28 = arith.constant 0 : index
    %24 = vector.load %arg4[%c0_27, %c3, %c0_28] : memref<1x4x4xf32, #tpu.memory_space<vmem>>, vector<1x1x4xf32>
    tpu.vector_store %arg4[%c0_27, %c3, %c0_28], %23 {strides = array<i32>} : memref<1x4x4xf32, #tpu.memory_space<vmem>>, vector<1x1x4xf32>,
    %c0_29 = arith.constant 0 : index
    %c0_30 = arith.constant 0 : index
    %c0_31 = arith.constant 0 : index
    %c0_32 = arith.constant 0 : index
    %25 = vector.load %arg2[%c0_29, %c0_30, %c0_31, %c0_32] : memref<1x16x16x4xf32, #tpu.memory_space<vmem>>, vector<1x6x16x4xf32>
    %cst_33 = arith.constant dense<0xFF800000> : vector<1x16x4xf32>
    %26 = vector.multi_reduction <maximumf>, %25, %cst_33 [1] : vector<1x6x16x4xf32> to vector<1x16x4xf32>
    %27 = vector.extract_strided_slice %26 {offsets = [0, 0, 0], sizes = [1, 6, 4], strides = [1, 1, 1]} : vector<1x16x4xf32> to vector<1x6x4xf32>
    %cst_34 = arith.constant dense<0xFF800000> : vector<1x4xf32>
    %28 = vector.multi_reduction <maximumf>, %27, %cst_34 [1] : vector<1x6x4xf32> to vector<1x4xf32>
    %29 = vector.shape_cast %28 : vector<1x4xf32> to vector<1x1x4xf32>
    %c0_35 = arith.constant 0 : index
    %c0_36 = arith.constant 0 : index
    %c0_37 = arith.constant 0 : index
    %30 = vector.load %arg5[%c0_35, %c0_36, %c0_37] : memref<1x9x4xf32, #tpu.memory_space<vmem>>, vector<1x1x4xf32>
    tpu.vector_store %arg5[%c0_35, %c0_36, %c0_37], %29 {strides = array<i32>} : memref<1x9x4xf32, #tpu.memory_space<vmem>>, vector<1x1x4xf32>,
    %31 = vector.extract_strided_slice %26 {offsets = [0, 5, 0], sizes = [1, 6, 4], strides = [1, 1, 1]} : vector<1x16x4xf32> to vector<1x6x4xf32>
    %cst_38 = arith.constant dense<0xFF800000> : vector<1x4xf32>
    %32 = vector.multi_reduction <maximumf>, %31, %cst_38 [1] : vector<1x6x4xf32> to vector<1x4xf32>
    %33 = vector.shape_cast %32 : vector<1x4xf32> to vector<1x1x4xf32>
    %c0_39 = arith.constant 0 : index
    %c1_40 = arith.constant 1 : index
    %c0_41 = arith.constant 0 : index
    %34 = vector.load %arg5[%c0_39, %c1_40, %c0_41] : memref<1x9x4xf32, #tpu.memory_space<vmem>>, vector<1x1x4xf32>
    tpu.vector_store %arg5[%c0_39, %c1_40, %c0_41], %33 {strides = array<i32>} : memref<1x9x4xf32, #tpu.memory_space<vmem>>, vector<1x1x4xf32>,
    %35 = vector.extract_strided_slice %26 {offsets = [0, 10, 0], sizes = [1, 6, 4], strides = [1, 1, 1]} : vector<1x16x4xf32> to vector<1x6x4xf32>
    %cst_42 = arith.constant dense<0xFF800000> : vector<1x4xf32>
    %36 = vector.multi_reduction <maximumf>, %35, %cst_42 [1] : vector<1x6x4xf32> to vector<1x4xf32>
    %37 = vector.shape_cast %36 : vector<1x4xf32> to vector<1x1x4xf32>
    %c0_43 = arith.constant 0 : index
    %c2_44 = arith.constant 2 : index
    %c0_45 = arith.constant 0 : index
    %38 = vector.load %arg5[%c0_43, %c2_44, %c0_45] : memref<1x9x4xf32, #tpu.memory_space<vmem>>, vector<1x1x4xf32>
    tpu.vector_store %arg5[%c0_43, %c2_44, %c0_45], %37 {strides = array<i32>} : memref<1x9x4xf32, #tpu.memory_space<vmem>>, vector<1x1x4xf32>,
    %c0_46 = arith.constant 0 : index
    %c5 = arith.constant 5 : index
    %c0_47 = arith.constant 0 : index
    %c0_48 = arith.constant 0 : index
    %39 = vector.load %arg2[%c0_46, %c5, %c0_47, %c0_48] : memref<1x16x16x4xf32, #tpu.memory_space<vmem>>, vector<1x6x16x4xf32>
    %cst_49 = arith.constant dense<0xFF800000> : vector<1x16x4xf32>
    %40 = vector.multi_reduction <maximumf>, %39, %cst_49 [1] : vector<1x6x16x4xf32> to vector<1x16x4xf32>
    %41 = vector.extract_strided_slice %40 {offsets = [0, 0, 0], sizes = [1, 6, 4], strides = [1, 1, 1]} : vector<1x16x4xf32> to vector<1x6x4xf32>
    %cst_50 = arith.constant dense<0xFF800000> : vector<1x4xf32>
    %42 = vector.multi_reduction <maximumf>, %41, %cst_50 [1] : vector<1x6x4xf32> to vector<1x4xf32>
    %43 = vector.shape_cast %42 : vector<1x4xf32> to vector<1x1x4xf32>
    %c0_51 = arith.constant 0 : index
    %c3_52 = arith.constant 3 : index
    %c0_53 = arith.constant 0 : index
    %44 = vector.load %arg5[%c0_51, %c3_52, %c0_53] : memref<1x9x4xf32, #tpu.memory_space<vmem>>, vector<1x1x4xf32>
    tpu.vector_store %arg5[%c0_51, %c3_52, %c0_53], %43 {strides = array<i32>} : memref<1x9x4xf32, #tpu.memory_space<vmem>>, vector<1x1x4xf32>,
    %45 = vector.extract_strided_slice %40 {offsets = [0, 5, 0], sizes = [1, 6, 4], strides = [1, 1, 1]} : vector<1x16x4xf32> to vector<1x6x4xf32>
    %cst_54 = arith.constant dense<0xFF800000> : vector<1x4xf32>
    %46 = vector.multi_reduction <maximumf>, %45, %cst_54 [1] : vector<1x6x4xf32> to vector<1x4xf32>
    %47 = vector.shape_cast %46 : vector<1x4xf32> to vector<1x1x4xf32>
    %c0_55 = arith.constant 0 : index
    %c4 = arith.constant 4 : index
    %c0_56 = arith.constant 0 : index
    %48 = vector.load %arg5[%c0_55, %c4, %c0_56] : memref<1x9x4xf32, #tpu.memory_space<vmem>>, vector<1x1x4xf32>
    tpu.vector_store %arg5[%c0_55, %c4, %c0_56], %47 {strides = array<i32>} : memref<1x9x4xf32, #tpu.memory_space<vmem>>, vector<1x1x4xf32>,
    %49 = vector.extract_strided_slice %40 {offsets = [0, 10, 0], sizes = [1, 6, 4], strides = [1, 1, 1]} : vector<1x16x4xf32> to vector<1x6x4xf32>
    %cst_57 = arith.constant dense<0xFF800000> : vector<1x4xf32>
    %50 = vector.multi_reduction <maximumf>, %49, %cst_57 [1] : vector<1x6x4xf32> to vector<1x4xf32>
    %51 = vector.shape_cast %50 : vector<1x4xf32> to vector<1x1x4xf32>
    %c0_58 = arith.constant 0 : index
    %c5_59 = arith.constant 5 : index
    %c0_60 = arith.constant 0 : index
    %52 = vector.load %arg5[%c0_58, %c5_59, %c0_60] : memref<1x9x4xf32, #tpu.memory_space<vmem>>, vector<1x1x4xf32>
    tpu.vector_store %arg5[%c0_58, %c5_59, %c0_60], %51 {strides = array<i32>} : memref<1x9x4xf32, #tpu.memory_space<vmem>>, vector<1x1x4xf32>,
    %c0_61 = arith.constant 0 : index
    %c10 = arith.constant 10 : index
    %c0_62 = arith.constant 0 : index
    %c0_63 = arith.constant 0 : index
    %53 = vector.load %arg2[%c0_61, %c10, %c0_62, %c0_63] : memref<1x16x16x4xf32, #tpu.memory_space<vmem>>, vector<1x6x16x4xf32>
    %cst_64 = arith.constant dense<0xFF800000> : vector<1x16x4xf32>
    %54 = vector.multi_reduction <maximumf>, %53, %cst_64 [1] : vector<1x6x16x4xf32> to vector<1x16x4xf32>
    %55 = vector.extract_strided_slice %54 {offsets = [0, 0, 0], sizes = [1, 6, 4], strides = [1, 1, 1]} : vector<1x16x4xf32> to vector<1x6x4xf32>
    %cst_65 = arith.constant dense<0xFF800000> : vector<1x4xf32>
    %56 = vector.multi_reduction <maximumf>, %55, %cst_65 [1] : vector<1x6x4xf32> to vector<1x4xf32>
    %57 = vector.shape_cast %56 : vector<1x4xf32> to vector<1x1x4xf32>
    %c0_66 = arith.constant 0 : index
    %c6 = arith.constant 6 : index
    %c0_67 = arith.constant 0 : index
    %58 = vector.load %arg5[%c0_66, %c6, %c0_67] : memref<1x9x4xf32, #tpu.memory_space<vmem>>, vector<1x1x4xf32>
    tpu.vector_store %arg5[%c0_66, %c6, %c0_67], %57 {strides = array<i32>} : memref<1x9x4xf32, #tpu.memory_space<vmem>>, vector<1x1x4xf32>,
    %59 = vector.extract_strided_slice %54 {offsets = [0, 5, 0], sizes = [1, 6, 4], strides = [1, 1, 1]} : vector<1x16x4xf32> to vector<1x6x4xf32>
    %cst_68 = arith.constant dense<0xFF800000> : vector<1x4xf32>
    %60 = vector.multi_reduction <maximumf>, %59, %cst_68 [1] : vector<1x6x4xf32> to vector<1x4xf32>
    %61 = vector.shape_cast %60 : vector<1x4xf32> to vector<1x1x4xf32>
    %c0_69 = arith.constant 0 : index
    %c7 = arith.constant 7 : index
    %c0_70 = arith.constant 0 : index
    %62 = vector.load %arg5[%c0_69, %c7, %c0_70] : memref<1x9x4xf32, #tpu.memory_space<vmem>>, vector<1x1x4xf32>
    tpu.vector_store %arg5[%c0_69, %c7, %c0_70], %61 {strides = array<i32>} : memref<1x9x4xf32, #tpu.memory_space<vmem>>, vector<1x1x4xf32>,
    %63 = vector.extract_strided_slice %54 {offsets = [0, 10, 0], sizes = [1, 6, 4], strides = [1, 1, 1]} : vector<1x16x4xf32> to vector<1x6x4xf32>
    %cst_71 = arith.constant dense<0xFF800000> : vector<1x4xf32>
    %64 = vector.multi_reduction <maximumf>, %63, %cst_71 [1] : vector<1x6x4xf32> to vector<1x4xf32>
    %65 = vector.shape_cast %64 : vector<1x4xf32> to vector<1x1x4xf32>
    %c0_72 = arith.constant 0 : index
    %c8_73 = arith.constant 8 : index
    %c0_74 = arith.constant 0 : index
    %66 = vector.load %arg5[%c0_72, %c8_73, %c0_74] : memref<1x9x4xf32, #tpu.memory_space<vmem>>, vector<1x1x4xf32>
    tpu.vector_store %arg5[%c0_72, %c8_73, %c0_74], %65 {strides = array<i32>} : memref<1x9x4xf32, #tpu.memory_space<vmem>>, vector<1x1x4xf32>,
    return
  }
  func.func @transform_0(%arg0: i32, %arg1: i32) -> (i32, i32, i32, i32) {
    %c0_i32 = arith.constant 0 : i32
    %c0_i32_0 = arith.constant 0 : i32
    %c0_i32_1 = arith.constant 0 : i32
    return %arg0, %c0_i32, %c0_i32_0, %arg1 : i32, i32, i32, i32
  }
  func.func @transform_1(%arg0: i32, %arg1: i32) -> (i32, i32, i32) {
    %c0_i32 = arith.constant 0 : i32
    %c0_i32_0 = arith.constant 0 : i32
    return %arg0, %c0_i32, %arg1 : i32, i32, i32
  }
  func.func @transform_2(%arg0: i32, %arg1: i32) -> (i32, i32, i32) {
    %c0_i32 = arith.constant 0 : i32
    %c0_i32_0 = arith.constant 0 : i32
    return %arg0, %c0_i32, %arg1 : i32, i32, i32
  }
  func.func @transform_3(%arg0: i32, %arg1: i32) -> (i32, i32, i32) {
    %c0_i32 = arith.constant 0 : i32
    %c0_i32_0 = arith.constant 0 : i32
    return %arg0, %c0_i32, %arg1 : i32, i32, i32
  }
}

</mosaic_0001>

<bundles_post_ra>
// kernel: tpu_custom_call.1
= control target key start
LH: loop header
LB: loop body
LE: loop exit
PB: predicated region body
PF: predicated region fallthrough
CT: control target
= control target key end

     0   :  { %9 = vsyncpa [#allocation3], 0  ;;  %s1476_s0 = inlined_call_operand.vmem [shape: f32[2,16,16,4], index: 0, kind: input, shape index: {}]   ;;  %s1477_s1 = inlined_call_operand.hbm [shape: f32[2,1,4], index: 1, kind: output, shape index: {0}]   ;;  %s1478_s2 = inlined_call_operand.hbm [shape: f32[2,4,4], index: 2, kind: output, shape index: {1}]   ;;  %s1479_s3 = inlined_call_operand.vmem [shape: f32[2,9,4], index: 3, kind: output, shape index: {2}]  }
   0x1   :  { %11 = vsyncpa [#allocation3 + $0x1], 0 }
   0x2   :  { %12 = vsyncpa [#allocation5], 0 }
   0x3   :  { %14 = vsyncpa [#allocation5 + $0x1], 0  ;;  %s1077_s12 = smov 0   ;;  %s1079_s13 = smov 0  }
   0x4   :  { %s1081_s14 = smov 0   ;;  %s1083_s15 = smov 0  }
   0x5   :  { %s1085_s16 = smov 0   ;;  %s1087_s17 = smov 0  }
   0x6 LB: > { %s826_s18 = sadd.s32 4294967295, %s1053_s17   ;;  %s827_s19 = sadd.s32 4294967294, %s1053_s17   ;;  %s1053_s17 = sphi %s1087_s17, %s20_s17   ;;  %s1049_s16 = sphi %s1085_s16, %s1486_s16   ;;  %s1045_s15 = sphi %s1083_s15, %s1485_s15   ;;  %s1041_s14 = sphi %s1081_s14, %s1484_s14   ;;  %s1037_s13 = sphi %s1079_s13, %s1483_s13   ;;  %s1033_s12 = sphi %s1077_s12, %s1482_s12  }
   0x7   : > { %s32_s20 = sadd.s32 1, %s1049_s16  ;;  %s69_s21 = sadd.s32 1, %s1041_s14 }
   0x8   : > { %p34_p0 = scmp.ge.s32.totalorder %s32_s20, 2  ;;  %p79_p1 = scmp.ne.s32.totalorder %s1041_s14, %s1037_s13 }
   0x9   : > { %p80_p2 = scmp.eq.s32.totalorder %s826_s18, 1  ;;  %p85_p3 = scmp.ne.s32.totalorder %s1037_s13, %s1033_s12 }
   0xa   : > { %s1488_s20 = smov (%p34_p0, %s32_s20), 0  ;;  %p86_p5 = scmp.eq.s32.totalorder %s827_s19, 1 }
   0xb   : > { %p1117_p4 = por %p80_p2, %p79_p1  ;;  %s64_s23 = ssub.s32 %s1049_s16, %s1488_s20 }
   0xc   : > { %p830_p6 = scmp.ge.s32.totalorder %s1053_s17, 1  ;;  %p67_p7 = scmp.eq.s32.totalorder %s64_s23, 0 }
   0xd   : > { %p1124_p8 = por %p86_p5, %p85_p3  ;;  %p171_p9 = scmp.lt.s32.totalorder %s1053_s17, 3 }
   0xe   : > { %s1130_s25 = scalar_select %p67_p7, %s1041_s14, %s69_s21  }
   0xf   : > { %p172_p10 = pnand %p830_p6, %p171_p9 }
  0x10   : > { %p210_p11 = scmp.lt.s32.totalorder (!%p172_p10), %s1045_s15, 1  ;;  %vm258_vm0 = vcmask (!%p172_p10), 31744   ;;  %vm491_vm1 = vcmask (!%p172_p10), 29696   ;;  %vm500_vm2 = vcmask (!%p172_p10), 31749   ;;  %vm502_vm3 = vcmask (!%p172_p10), 26624   ;;  %s1299_s4 = sand.u32 (!%p172_p10), 1, %s1037_s13  }
  0x11   : > { %175 = sbr.rel (%p172_p10) target bundleno = 130 (0x82), region = 24  ;;  %vm512_vm4 = vcmask (!%p172_p10), 31746   ;;  %vm330_vm5 = vcmask (!%p172_p10), 24576   ;;  %s831_s5 = sshll.u32 (!%p172_p10), %s1299_s4, 2 }
  0x12   : > { %s192_s6 = scalar_lea.vmem (!%p172_p10), [#allocation2], %s1299_s4  ;;  %s1321_s8 = scalar_lea.vmem (!%p172_p10), [#allocation4], %s831_s5 }
  0x13   : > { %s670_s7 = sshll.u32 (!%p172_p10), %s192_s6, 4  ;;  %s877_s10 = sshll.u32 (!%p172_p10), %s1045_s15, 4  ;;  %s1334_s7 = int_to_ptr.vmem [resolvable:$true] %s670_s7 }
  0x14   : > { %s878_s21 = sshll.u32 (!%p172_p10), %s1045_s15, 6  ;;  %s684_s23 = sshll.u32 (!%p172_p10), %s1321_s8, 4  ;;  %s1368_s23 = int_to_ptr.vmem [resolvable:$true] %s684_s23 }
  0x15   : > { %s1349_s28 = scalar_lea.hbm (!%p172_p10), %s1477_s1, %s877_s10  ;;  %s644_s5 = scalar_lea.sflag (!%p172_p10), [#allocation3], %s1299_s4 }
  0x18   : > { %s1134_s26 = scalar_select %p210_p11, %s1045_s15, 1 }
  0x1a   : > { %s881_s27 = sshll.u32 %s1134_s26, 8  ;;  %s882_s9 = sshll.u32 %s1134_s26, 4 }
  0x1b   : > { %s1140_s30 = scalar_lea.vmem %s1476_s0, %s881_s27  ;;  %s1339_s19 = scalar_lea.vmem %s1479_s3, %s882_s9 }
  0x1c   : > { %v226_v0 = vld [vmem:[%s1140_s30] sm:$0xff]  ;;  %v227_v1 = vld [vmem:[%s1140_s30 + $0x8] sm:$0xff]  ;;  %v228_v2 = vld [vmem:[%s1140_s30 + $0x10] sm:$0xff]  ;;  %s1055_s9 = smov [#allocation2]  }
  0x1d   : > { %v229_v3 = vld [vmem:[%s1140_s30 + $0x18] sm:$0xff]  ;;  %v230_v4 = vld [vmem:[%s1140_s30 + $0x20] sm:$0xff]  ;;  %v231_v5 = vld [vmem:[%s1140_s30 + $0x28] sm:$0xff]  ;;  %v259_v6 = vsel %vm258_vm0, %v226_v0, -inf  ;;  %v260_v7 = vsel %vm258_vm0, %v228_v2, -inf  ;;  %v290_v8 = vsel %vm258_vm0, %v227_v1, -inf }
  0x1e   : > { %v232_v9 = vld [vmem:[%s1140_s30 + $0x30] sm:$0xff]  ;;  %v233_v10 = vld [vmem:[%s1140_s30 + $0x38] sm:$0xff]  ;;  %v234_v11 = vld [vmem:[%s1140_s30 + $0x40] sm:$0xff]  ;;  %v261_v12 = vsel %vm258_vm0, %v230_v4, -inf  ;;  %v291_v13 = vsel %vm258_vm0, %v229_v3, -inf  ;;  %v292_v14 = vsel %vm258_vm0, %v231_v5, -inf }
  0x1f   : > { %v235_v15 = vld [vmem:[%s1140_s30 + $0x48] sm:$0xff]  ;;  %v236_v16 = vld [vmem:[%s1140_s30 + $0x50] sm:$0xff]  ;;  %v237_v17 = vld [vmem:[%s1140_s30 + $0x58] sm:$0xff]  ;;  %v262_v18 = vmax.f32 %v259_v6, %v261_v12  ;;  %v263_v19 = vsel %vm258_vm0, %v232_v9, -inf  ;;  %v265_v20 = vsel %vm258_vm0, %v234_v11, -inf  ;;  %v293_v21 = vmax.f32 %v290_v8, %v292_v14  ;;  %s947_s10 = sshll.u32 %s1055_s9, 4  ;;  %s948_s10 = int_to_ptr.vmem [resolvable:$false] %s947_s10 }
  0x20   : > { %v238_v22 = vld [vmem:[%s1140_s30 + $0x60] sm:$0xff]  ;;  %v240_v23 = vld [vmem:[%s1140_s30 + $0x70] sm:$0xff]  ;;  %v264_v24 = vmax.f32 %v260_v7, %v263_v19  ;;  %v1165_v25 = vsel %vm258_vm0, %v236_v16, -inf  ;;  %v294_v26 = vsel %vm258_vm0, %v233_v10, -inf  ;;  %v296_v27 = vsel %vm258_vm0, %v235_v15, -inf  ;;  %v239_v28 = vld [vmem:[%s1140_s30 + $0x68] sm:$0xff]  ;;  %p950_p1 = scmp.lt.s32.totalorder %s1334_s7, %s948_s10 }
  0x21   : > { %v241_v29 = vld [vmem:[%s1140_s30 + $0x78] sm:$0xff]  ;;  %v242_v30 = vld [vmem:[%s1140_s30 + $0x80] sm:$0xff]  ;;  %v1172_v31 = vmax.f32 %v262_v18, %v265_v20  ;;  %v1175_v32 = vsel %vm258_vm0, %v238_v22, -inf  ;;  %v1178_v33 = vsel %vm258_vm0, %v240_v23, -inf  ;;  %v295_v34 = vmax.f32 %v291_v13, %v294_v26  ;;  %v244_v35 = vld [vmem:[%s1140_s30 + $0x90] sm:$0xff]  ;;  %s949_s11 = scalar_lea.vmem %s948_s10, 32 }
  0x22   : > { %v246_v36 = vld [vmem:[%s1140_s30 + $0xa0] sm:$0xff]  ;;  %v1183_v37 = vmax.f32 %v264_v24, %v1165_v25  ;;  %v1186_v38 = vsel %vm258_vm0, %v242_v30, -inf  ;;  %v1188_v39 = vmax.f32 %v293_v21, %v296_v27  ;;  %v1191_v40 = vsel %vm258_vm0, %v237_v17, -inf  ;;  %v243_v41 = vld [vmem:[%s1140_s30 + $0x88] sm:$0xff]  ;;  %v248_v42 = vld [vmem:[%s1140_s30 + $0xb0] sm:$0xff] }
  0x23   : > { %v270_v43 = vmax.f32 %v1172_v31, %v1175_v32  ;;  %v1198_v44 = vsel %vm258_vm0, %v244_v35, -inf  ;;  %v1201_v45 = vsel %vm258_vm0, %v246_v36, -inf  ;;  %v1204_v46 = vmax.f32 %v295_v34, %v1191_v40  ;;  %v245_v47 = vld [vmem:[%s1140_s30 + $0x98] sm:$0xff]  ;;  %v250_v48 = vld [vmem:[%s1140_s30 + $0xc0] sm:$0xff]  ;;  %v252_v49 = vld [vmem:[%s1140_s30 + $0xd0] sm:$0xff] }
  0x24   : > { %v272_v50 = vmax.f32 %v1183_v37, %v1178_v33  ;;  %v1212_v51 = vsel %vm258_vm0, %v248_v42, -inf  ;;  %v1215_v52 = vsel %vm258_vm0, %v239_v28, -inf  ;;  %v1218_v53 = vsel %vm258_vm0, %v241_v29, -inf  ;;  %v247_v54 = vld [vmem:[%s1140_s30 + $0xa8] sm:$0xff]  ;;  %v249_v55 = vld [vmem:[%s1140_s30 + $0xb8] sm:$0xff]  ;;  %v254_v56 = vld [vmem:[%s1140_s30 + $0xe0] sm:$0xff] }
  0x25   : > { %v274_v57 = vmax.f32 %v270_v43, %v1186_v38  ;;  %v1225_v58 = vsel %vm258_vm0, %v250_v48, -inf  ;;  %v1228_v59 = vsel %vm258_vm0, %v252_v49, -inf  ;;  %v301_v60 = vmax.f32 %v1188_v39, %v1215_v52  ;;  %v251_v61 = vld [vmem:[%s1140_s30 + $0xc8] sm:$0xff]  ;;  %v253_v62 = vld [vmem:[%s1140_s30 + $0xd8] sm:$0xff]  ;;  %v256_v63 = vld [vmem:[%s1140_s30 + $0xf0] sm:$0xff] }
  0x26   : > { %v276_v0 = vmax.f32 %v272_v50, %v1198_v44  ;;  %v1237_v1 = vsel %vm258_vm0, %v254_v56, -inf  ;;  %v303_v2 = vmax.f32 %v1204_v46, %v1218_v53  ;;  %v1242_v3 = vsel %vm258_vm0, %v243_v41, -inf  ;;  %v255_v4 = vld [vmem:[%s1140_s30 + $0xe8] sm:$0xff]  ;;  %v257_v5 = vld [vmem:[%s1140_s30 + $0xf8] sm:$0xff]  ;;  %s1366_s30 = scalar_lea.hbm %s1478_s2, %s878_s21 }
  0x27   : > { %v278_v6 = vmax.f32 %v274_v57, %v1201_v45  ;;  %v1248_v7 = vsel %vm258_vm0, %v256_v63, -inf  ;;  %v305_v8 = vmax.f32 %v301_v60, %v1242_v3  ;;  %v1252_v9 = vsel %vm258_vm0, %v245_v47, -inf }
  0x28   : > { %v280_v10 = vmax.f32 %v276_v0, %v1212_v51  ;;  %v307_v11 = vmax.f32 %v303_v2, %v1252_v9  ;;  %v1257_v12 = vsel %vm258_vm0, %v247_v54, -inf  ;;  %v1260_v13 = vsel %vm258_vm0, %v249_v55, -inf }
  0x29   : > { %v282_v14 = vmax.f32 %v278_v6, %v1225_v58  ;;  %v309_v15 = vmax.f32 %v305_v8, %v1257_v12  ;;  %v1265_v16 = vsel %vm258_vm0, %v251_v61, -inf  ;;  %v1268_v17 = vsel %vm258_vm0, %v253_v62, -inf }
  0x2a   : > { %v284_v18 = vmax.f32 %v280_v10, %v1228_v59  ;;  %v311_v19 = vmax.f32 %v307_v11, %v1260_v13  ;;  %v1273_v20 = vsel %vm258_vm0, %v255_v4, -inf  ;;  %v1276_v21 = vsel %vm258_vm0, %v257_v5, -inf }
  0x2b   : > { %v286_v22 = vmax.f32 %v282_v14, %v1237_v1  ;;  %v313_v23 = vmax.f32 %v309_v15, %v1265_v16  ;;  %v362_v24 = vmax.f32 %v270_v43, %v272_v50  ;;  %v377_v26 = vmax.f32 %v301_v60, %v303_v2 }
  0x2c   : > { %v288_v27 = vmax.f32 %v284_v18, %v1248_v7  ;;  %v315_v28 = vmax.f32 %v311_v19, %v1268_v17  ;;  %v414_v29 = vmax.f32 %v1186_v38, %v1201_v45  ;;  %v416_v30 = vmax.f32 %v1198_v44, %v1212_v51 }
  0x2d   : > { %v317_v34 = vmax.f32 %v313_v23, %v1273_v20  ;;  %v378_v35 = vsel %vm258_vm0, %v362_v24, -inf  ;;  %v386_v36 = vsel %vm258_vm0, %v377_v26, -inf  ;;  %v429_v41 = vmax.f32 %v1242_v3, %v1257_v12 }
  0x2e   : > { %v289_v42 = vmax.f32 %v286_v22, %v288_v27  ;;  %v319_v43 = vmax.f32 %v315_v28, %v1276_v21  ;;  %v379_v47 = vrot.slane %v378_v35, 4  ;;  %v387_v48 = vrot.slane %v386_v36, 4 }
  0x2f   : > { %v418_v49 = vmax.f32 %v414_v29, %v1225_v58  ;;  %v420_v50 = vmax.f32 %v416_v30, %v1228_v59  ;;  %v431_v54 = vmax.f32 %v1252_v9, %v1260_v13  ;;  %v433_v55 = vmax.f32 %v429_v41, %v1265_v16 }
  0x30   : > { %v320_v56 = vmax.f32 %v317_v34, %v319_v43  ;;  %v321_v57 = vsel %vm258_vm0, %v289_v42, -inf  ;;  %v380_v60 = vmax.f32 %v378_v35, %v379_v47  ;;  %v388_v61 = vmax.f32 %v386_v36, %v387_v48 }
  0x31   : > { %v422_v62 = vmax.f32 %v418_v49, %v1237_v1  ;;  %v424_v63 = vmax.f32 %v420_v50, %v1248_v7  ;;  %v435_v0 = vmax.f32 %v431_v54, %v1268_v17  ;;  %v437_v2 = vmax.f32 %v433_v55, %v1273_v20 }
  0x32   : > { %v322_v4 = vsel %vm258_vm0, %v320_v56, -inf  ;;  %v381_v5 = vrot.slane %v380_v60, 2  ;;  %v389_v6 = vrot.slane %v388_v61, 2  ;;  %v479_v8 = vmax.f32 %v1172_v31, %v1183_v37 }
  0x33   : > { %v323_v10 = vmax.f32 %v321_v57, %v322_v4  ;;  %v425_v11 = vmax.f32 %v422_v62, %v424_v63  ;;  %v439_v14 = vmax.f32 %v435_v0, %v1276_v21  ;;  %v490_v15 = vmax.f32 %v1188_v39, %v1204_v46 }
  0x34   : > { %v382_v18 = vmax.f32 %v380_v60, %v381_v5  ;;  %v390_v19 = vmax.f32 %v388_v61, %v389_v6  ;;  %v492_v22 = vsel %vm491_vm1, %v479_v8, -inf  ;;  %v501_v23 = vsel %vm500_vm2, %v479_v8, -inf }
  0x35   : > { %v324_v24 = vrot.slane %v323_v10, 4  ;;  %v441_v26 = vsel %vm258_vm0, %v425_v11, -inf  ;;  %v440_v27 = vmax.f32 %v437_v2, %v439_v14  ;;  %v493_v28 = vrot.slane %v492_v22, 4 }
  0x36   : > { %v383_v31 = vrot.slane %v382_v18, 1  ;;  %v391_v37 = vrot.slane %v390_v19, 1  ;;  %v442_v29 = vrot.slane %v441_v26, 4  ;;  %v503_v30 = vsel %vm502_vm3, %v490_v15, -inf }
  0x37   : > { %v325_v39 = vmax.f32 %v323_v10, %v324_v24  ;;  %v449_v46 = vsel %vm258_vm0, %v440_v27, -inf  ;;  %v494_v34 = vmax.f32 %v492_v22, %v493_v28  ;;  %v504_v35 = vmax.f32 %v501_v23, %v503_v30 }
  0x38   : > { %v384_v36 = vmax.f32 %v382_v18, %v383_v31  ;;  %v392_v41 = vmax.f32 %v390_v19, %v391_v37  ;;  %v443_v42 = vmax.f32 %v441_v26, %v442_v29  ;;  %v450_v43 = vrot.slane %v449_v46, 4 }
  0x39   : > { %v326_v47 = vrot.slane %v325_v39, 2  ;;  %v495_v48 = vrot.slane %v494_v34, 2  ;;  %v505_v49 = vrot.slane %v504_v35, 4  ;;  %v513_v50 = vsel %vm512_vm4, %v490_v15, -inf }
  0x3a   : > { %385 = vst.msk [vmem:[%s1321_s8] sm:$0x1] %vm330_vm5, %v384_v36  ;;  %393 = vst.msk [vmem:[%s1321_s8 + $0x1] sm:$0x1] %vm330_vm5, %v392_v41  ;;  %v444_v54 = vrot.slane %v443_v42, 2  ;;  %v451_v55 = vmax.f32 %v449_v46, %v450_v43  ;;  %v514_v56 = vrot.slane %v513_v50, 4  ;;  %v537_v57 = vmax.f32 %v1165_v25, %v1178_v33 }
  0x3b   : > { %v327_v60 = vmax.f32 %v325_v39, %v326_v47  ;;  %v496_v61 = vmax.f32 %v494_v34, %v495_v48  ;;  %v506_v62 = vmax.f32 %v504_v35, %v505_v49  ;;  %v539_v63 = vmax.f32 %v1175_v32, %v1186_v38 }
  0x3c   : > { %v445_v0 = vmax.f32 %v443_v42, %v444_v54  ;;  %v452_v2 = vrot.slane %v451_v55, 2  ;;  %v515_v4 = vmax.f32 %v513_v50, %v514_v56  ;;  %v541_v5 = vmax.f32 %v537_v57, %v1198_v44 }
  0x3d   : > { %v328_v6 = vrot.slane %v327_v60, 1  ;;  %v497_v25 = vrot.slane %v496_v61, 1  ;;  %v507_v33 = vrot.slane %v506_v62, 2  ;;  %v543_v32 = vmax.f32 %v539_v63, %v1201_v45 }
  0x3e   : > { %v446_v38 = vrot.slane %v445_v0, 1  ;;  %v453_v8 = vmax.f32 %v451_v55, %v452_v2  ;;  %v516_v10 = vrot.slane %v515_v4, 2  ;;  %v548_v44 = vmax.f32 %v1191_v40, %v1218_v53 }
  0x3f   : > { %v329_v11 = vmax.f32 %v327_v60, %v328_v6  ;;  %v498_v14 = vmax.f32 %v496_v61, %v497_v25  ;;  %v508_v15 = vmax.f32 %v506_v62, %v507_v33  ;;  %v544_v18 = vmax.f32 %v541_v5, %v543_v32 }
  0x40   : > { %v447_v19 = vmax.f32 %v445_v0, %v446_v38  ;;  %v454_v22 = vrot.slane %v453_v8, 1  ;;  %v517_v23 = vmax.f32 %v515_v4, %v516_v10  ;;  %v550_v40 = vmax.f32 %v1215_v52, %v1242_v3 }
  0x41   : > { %331 = vst.msk [vmem:[%s192_s6] sm:$0x1] %vm330_vm5, %v329_v11  ;;  %499 = vst.msk [vmem:[%s1339_s19] sm:$0x1] %vm330_vm5, %v498_v14  ;;  %v509_v53 = vrot.slane %v508_v15, 1  ;;  %v556_v24 = vsel %vm491_vm1, %v544_v18, -inf  ;;  %v552_v26 = vmax.f32 %v548_v44, %v1252_v9 }
  0x42   : > { %v1361_v27 = vsel %vm500_vm2, %v544_v18, -inf  ;;  %448 = vst.msk [vmem:[%s1321_s8 + $0x2] sm:$0x1] %vm330_vm5, %v447_v19  ;;  %v455_v52 = vmax.f32 %v453_v8, %v454_v22  ;;  %v518_v3 = vrot.slane %v517_v23, 1  ;;  %v557_v28 = vrot.slane %v556_v24, 4  ;;  %s943_s6 = scalar_lea.vmem %s1334_s7, 16 }
  0x43   : > { %v554_v31 = vmax.f32 %v550_v40, %v1257_v12  ;;  %p944_p12 = scmp.ne.s32.totalorder %s1334_s7, %s943_s6  ;;  %p951_p2 = scmp.lt.s32.totalorder %s949_s11, %s943_s6 }
  0x45   : > { %p945_p13 = pnand %p944_p12, %p1117_p4  ;;  %p952_p3 = por %p951_p2, %p950_p1 }
  0x47   : > { %p946_p0 = pneg %p945_p13 }
  0x49   : > { %p953_p5 = pnand %p952_p3, %p946_p0 }
  0x4b   : > { %956 = shalt.err (!%p953_p5)
}
  0x4c   : > { %s957_s18 = scalar_lea.hbm %s1349_s28, 16  ;;  %s961_s27 = scalar_lea.hbm %s1477_s1, 32 }
  0x4d   : > { %p958_p6 = scmp.ne.s32.totalorder %s1349_s28, %s957_s18  ;;  %p962_p10 = scmp.lt.u32.totalorder %s1349_s28, %s1477_s1 }
  0x4e   : > { %p963_p11 = scmp.lt.u32.totalorder %s961_s27, %s957_s18  ;;  %p965_p13 = scmp.lt.u32.totalorder %s957_s18, %s1349_s28 }
  0x4f   : > { %p959_p7 = pnand %p958_p6, %p1117_p4 }
  0x50   : > { %p964_p12 = por %p963_p11, %p962_p10 }
  0x51   : > { %p960_p9 = pneg %p959_p7 }
  0x52   : > { %p966_p0 = por %p965_p13, %p964_p12 }
  0x54   : > { %p967_p1 = pnand %p966_p0, %p960_p9 }
  0x56   : > { %970 = shalt.err (!%p967_p1)
}
  0x57   : > { %883 = dma.vmem_to_hbm [thread:$0]  (%p1117_p4), %s1334_s7, 16, %s1349_s28, %s644_s5   ;;  %v510_v9 = vmax.f32 %v508_v15, %v509_v53  ;;  %v598_v37 = vmax.f32 %v1201_v45, %v1225_v58  ;;  %v600_v29 = vmax.f32 %v1212_v51, %v1228_v59  ;;  %v609_v30 = vmax.f32 %v1257_v12, %v1265_v16  ;;  %456 = vst.msk [vmem:[%s1321_s8 + $0x3] sm:$0x1] %vm330_vm5, %v455_v52 }
  0x58   : > { %v519_v39 = vmax.f32 %v517_v23, %v518_v3  ;;  %v558_v46 = vmax.f32 %v556_v24, %v557_v28  ;;  %v555_v34 = vmax.f32 %v552_v26, %v554_v31  ;;  %v611_v35 = vmax.f32 %v1260_v13, %v1268_v17  ;;  %s648_s7 = scalar_lea.sflag [#allocation5], %s1299_s4  ;;  %s971_s28 = scalar_lea.vmem %s1368_s23, 64 }
  0x59   : > { %511 = vst.msk [vmem:[%s1339_s19 + $0x1] sm:$0x1] %vm330_vm5, %v510_v9  ;;  %v602_v36 = vmax.f32 %v598_v37, %v1237_v1  ;;  %v604_v45 = vmax.f32 %v600_v29, %v1248_v7  ;;  %v613_v51 = vmax.f32 %v609_v30, %v1273_v20  ;;  %p972_p2 = scmp.ne.s32.totalorder %s1368_s23, %s971_s28  ;;  %s1056_s8 = smov [#allocation4]  }
  0x5a   : > { %s975_s5 = sshll.u32 %s1056_s8, 4  ;;  %s976_s5 = int_to_ptr.vmem [resolvable:$false] %s975_s5 }
  0x5b   : > { %p973_p3 = pnand %p972_p2, %p1117_p4  ;;  %s977_s6 = scalar_lea.vmem %s976_s5, 128 }
  0x5c   : > { %p978_p6 = scmp.lt.s32.totalorder %s1368_s23, %s976_s5  ;;  %p979_p7 = scmp.lt.s32.totalorder %s977_s6, %s971_s28 }
  0x5d   : > { %p974_p5 = pneg %p973_p3 }
  0x5e   : > { %p980_p9 = por %p979_p7, %p978_p6 }
  0x60   : > { %p981_p10 = pnand %p980_p9, %p974_p5 }
  0x62   : > { %984 = shalt.err (!%p981_p10)
}
  0x63   : > { %s985_s4 = scalar_lea.hbm %s1366_s30, 64  ;;  %s989_s11 = scalar_lea.hbm %s1478_s2, 128 }
  0x64   : > { %p986_p11 = scmp.ne.s32.totalorder %s1366_s30, %s985_s4  ;;  %p990_p0 = scmp.lt.u32.totalorder %s1366_s30, %s1478_s2 }
  0x65   : > { %p991_p1 = scmp.lt.u32.totalorder %s989_s11, %s985_s4  ;;  %p993_p3 = scmp.lt.u32.totalorder %s985_s4, %s1366_s30 }
  0x66   : > { %p987_p12 = pnand %p986_p11, %p1117_p4 }
  0x67   : > { %p992_p2 = por %p991_p1, %p990_p0 }
  0x68   : > { %p988_p13 = pneg %p987_p12 }
  0x69   : > { %p994_p5 = por %p993_p3, %p992_p2 }
  0x6b   : > { %p995_p6 = pnand %p994_p5, %p988_p13 }
  0x6d   : > { %998 = shalt.err (!%p995_p6)
}
  0x6e   : > { %884 = dma.vmem_to_hbm [thread:$0]  (%p1117_p4), %s1368_s23, 64, %s1366_s30, %s648_s7   ;;  %520 = vst.msk [vmem:[%s1339_s19 + $0x2] sm:$0x1] %vm330_vm5, %v519_v39  ;;  %v559_v58 = vrot.slane %v558_v46, 2  ;;  %v565_v59 = vsel %vm502_vm3, %v555_v34, -inf  ;;  %v574_v1 = vsel %vm512_vm4, %v555_v34, -inf  ;;  %v615_v7 = vmax.f32 %v611_v35, %v1276_v21 }
  0x6f   : > { %v566_v12 = vmax.f32 %v1361_v27, %v565_v59  ;;  %v575_v13 = vrot.slane %v574_v1, 4  ;;  %v605_v16 = vmax.f32 %v602_v36, %v604_v45 }
  0x70   : > { %v560_v17 = vmax.f32 %v558_v46, %v559_v58  ;;  %v616_v20 = vmax.f32 %v613_v51, %v615_v7 }
  0x71   : > { %v567_v41 = vrot.slane %v566_v12, 4  ;;  %v576_v42 = vmax.f32 %v574_v1, %v575_v13  ;;  %v617_v43 = vsel %vm491_vm1, %v605_v16, -inf  ;;  %v625_v47 = vsel %vm500_vm2, %v605_v16, -inf }
  0x72   : > { %v561_v48 = vrot.slane %v560_v17, 1  ;;  %v618_v49 = vrot.slane %v617_v43, 4  ;;  %v626_v50 = vsel %vm502_vm3, %v616_v20, -inf  ;;  %v635_v54 = vsel %vm512_vm4, %v616_v20, -inf }
  0x73   : > { %v568_v21 = vmax.f32 %v566_v12, %v567_v41  ;;  %v577_v55 = vrot.slane %v576_v42, 2  ;;  %v627_v56 = vmax.f32 %v625_v47, %v626_v50  ;;  %v636_v57 = vrot.slane %v635_v54, 4 }
  0x74   : > { %v562_v60 = vmax.f32 %v560_v17, %v561_v48  ;;  %v619_v61 = vmax.f32 %v617_v43, %v618_v49 }
  0x75   : > { %v569_v62 = vrot.slane %v568_v21, 2  ;;  %v578_v63 = vmax.f32 %v576_v42, %v577_v55  ;;  %v628_v0 = vrot.slane %v627_v56, 4  ;;  %v637_v2 = vmax.f32 %v635_v54, %v636_v57 }
  0x76   : > { %563 = vst.msk [vmem:[%s1339_s19 + $0x3] sm:$0x1] %vm330_vm5, %v562_v60  ;;  %v620_v4 = vrot.slane %v619_v61, 2 }
  0x77   : > { %v570_v5 = vmax.f32 %v568_v21, %v569_v62  ;;  %v579_v6 = vrot.slane %v578_v63, 1  ;;  %v629_v25 = vmax.f32 %v627_v56, %v628_v0  ;;  %v638_v33 = vrot.slane %v637_v2, 2 }
  0x78   : > { %v621_v32 = vmax.f32 %v619_v61, %v620_v4 }
  0x79   : > { %v571_v38 = vrot.slane %v570_v5, 1  ;;  %v580_v8 = vmax.f32 %v578_v63, %v579_v6  ;;  %v630_v10 = vrot.slane %v629_v25, 2  ;;  %v639_v44 = vmax.f32 %v637_v2, %v638_v33 }
  0x7a   : > { %v622_v11 = vrot.slane %v621_v32, 1 }
  0x7b   : > { %v572_v14 = vmax.f32 %v570_v5, %v571_v38  ;;  %581 = vst.msk [vmem:[%s1339_s19 + $0x5] sm:$0x1] %vm330_vm5, %v580_v8  ;;  %v631_v15 = vmax.f32 %v629_v25, %v630_v10  ;;  %v640_v18 = vrot.slane %v639_v44, 1 }
  0x7c   : > { %v623_v19 = vmax.f32 %v621_v32, %v622_v11 }
  0x7d   : > { %573 = vst.msk [vmem:[%s1339_s19 + $0x4] sm:$0x1] %vm330_vm5, %v572_v14  ;;  %v632_v22 = vrot.slane %v631_v15, 1  ;;  %v641_v23 = vmax.f32 %v639_v44, %v640_v18 }
  0x7e   : > { %624 = vst.msk [vmem:[%s1339_s19 + $0x6] sm:$0x1] %vm330_vm5, %v623_v19 }
  0x7f   : > { %v633_v40 = vmax.f32 %v631_v15, %v632_v22  ;;  %642 = vst.msk [vmem:[%s1339_s19 + $0x8] sm:$0x1] %vm330_vm5, %v641_v23 }
  0x81   : > { %634 = vst.msk [vmem:[%s1339_s19 + $0x7] sm:$0x1] %vm330_vm5, %v633_v40 }
  0x82 PF: > { %p894_p4 = scmp.ge.s32.totalorder %s1053_s17, 2  ;;  %s699_s22 = sand.u32 1, %s1033_s12  }
  0x83   : > { %s700_s23 = scalar_lea.sflag [#allocation3], %s699_s22 }
  0x84   : > { %p888_p7 = pnand %p894_p4, %p1124_p8 }
  0x86   : > { %1024 = dma.done.wait (!%p888_p7), %s700_s23, 16  }
  0x87   : > { %1026 = vsyncadd (!%p888_p7), %s700_s23, 4294967280  ;;  %s708_s30 = scalar_lea.sflag [#allocation5], %s699_s22 }
  0x88   : > { %1028 = dma.done.wait (!%p888_p7), %s708_s30, 64  }
  0x89   : > { %1030 = vsyncadd (!%p888_p7), %s708_s30, 4294967232  ;;  %s20_s17 = sadd.s32 1, %s1053_s17   ;;  %s1482_s12 = smov %s1037_s13 }
  0x8a   : > { %p17_p9 = scmp.ge.s32.totalorder %s20_s17, 4   ;;  %s1483_s13 = smov %s1041_s14 }
  0x8b   : > { %s1484_s14 = smov %s1130_s25  ;;  %s1485_s15 = smov %s1049_s16 }
  0x8c   : > { %s1486_s16 = smov %s1488_s20  ;;  %19 = sbr.rel (!%p17_p9) target bundleno = 6 (0x6), region = 91 }
  0x93   :  { %724 = vsyncpa [#allocation3], 1 }
  0x94   :  { %726 = vsyncpa [#allocation3 + $0x1], 1 }
  0x95   :  { %727 = vsyncpa [#allocation5], 1 }
  0x96   :  { %729 = vsyncpa [#allocation5 + $0x1], 1 }

</bundles_post_ra>
